<compile_context>
chip_gen: v7x
topology: tpu7x:2x2x1
jax: 0.10.0
libtpu: 0.0.40
codegen_flags: <defaults>
</compile_context>

<pallas_src>
import jax
import jax.numpy as jnp
from jax.experimental import pallas as pl
from jax.experimental.pallas import tpu as pltpu


def _round_up(v, m):
    return ((v + m - 1) // m) * m


# Conservative double-buffer budget that holds on v5e/v6e (128 MiB VMEM) and
# v7x (64 MiB VMEM, ~32 MiB scoped default).
_VMEM_BUDGET_BYTES = 24 * 1024 * 1024
_VMEM_LIMIT_BYTES = 48 * 1024 * 1024


def _tile_vmem_bytes(tm, tk, tn):
    """Double-buffered bf16 A/X input tiles + double-buffered f32 out tile."""
    return 2 * (tm * tk + tk * tn) * 2 + 2 * tm * tn * 4


def _select_tiles(M, K, N):
    Mr, Kr, Nr = _round_up(M, 8), _round_up(K, 128), _round_up(N, 128)

    tm = min(256, Mr)
    # Collapse the j axis for modest feature dims so each A tile is streamed
    # from HBM exactly once; otherwise keep a lane-dense 512 tile.
    tn = Nr if Nr <= 1024 else 512
    # v7x megacore: if the parallel (i, j) grid would be 1x1, split M so both
    # TensorCores get work.
    if Mr <= tm and Nr <= tn and Mr > 8:
        tm = _round_up((Mr + 1) // 2, 8)

    # Largest K tile (<= 4096, multiple of 128) within the VMEM budget.
    tk = min(Kr, 4096)
    while tk > 128 and _tile_vmem_bytes(tm, tk, tn) > _VMEM_BUDGET_BYTES:
        tk = max(128, _round_up(tk // 2, 128))
    return tm, tk, tn


# ---------------------------------------------------------------------------
# Kernels
# ---------------------------------------------------------------------------
def _matmul_kernel_single_k(a_ref, x_ref, o_ref):
    # Whole K fits in one tile: single MXU pass, write the output block once.
    o_ref[...] = jnp.dot(a_ref[...], x_ref[...],
                         preferred_element_type=jnp.float32)


def _matmul_kernel_kskip(kidx_ref, cnt_ref, a_ref, x_ref, o_ref):
    # K-reduction resident in the f32 output block.  Only the first cnt[i]
    # k-steps carry real (nonzero) A blocks; later steps repeat the previous
    # block index in the index_maps (DMA elided) and skip the MXU here.
    i = pl.program_id(0)
    k = pl.program_id(2)
    del kidx_ref  # consumed by the index_maps only

    @pl.when(k == 0)
    def _():
        o_ref[...] = jnp.zeros_like(o_ref)

    @pl.when(k < cnt_ref[i])
    def _():
        o_ref[...] += jnp.dot(a_ref[...], x_ref[...],
                              preferred_element_type=jnp.float32)


# ---------------------------------------------------------------------------
# Wrapper
# ---------------------------------------------------------------------------
def sparse_matmul_pallas(shape, rows, cols, vals, x, *, tm=None, tn=None,
                         tk=None):
    """Compute coo(shape, rows, cols, vals) @ x on the MXU.

    shape: (n_rows, n_cols)
    rows, cols: (nnz,) int32 COO indices
    vals: (nnz,) float values
    x: (n_cols, d) dense tensor
    returns: (n_rows, d) float32
    """
    M, K = shape
    K2, N = x.shape
    if K != K2:
        raise ValueError(
            f"Shape mismatch: self.shape={(M, K)}, other.shape={(K2, N)}. "
            f"{K} != {K2}."
        )

    a_tm, a_tk, a_tn = _select_tiles(M, K, N)
    tm = a_tm if tm is None else min(_round_up(int(tm), 8), _round_up(M, 8))
    tn = a_tn if tn is None else min(_round_up(int(tn), 128), _round_up(N, 128))
    tk = a_tk if tk is None else min(_round_up(int(tk), 128), _round_up(K, 128))

    Mp, Kp, Np = _round_up(M, tm), _round_up(K, tk), _round_up(N, tn)
    Mb, Kb, Nb = Mp // tm, Kp // tk, Np // tn

    rows = jnp.asarray(rows, dtype=jnp.int32)
    cols = jnp.asarray(cols, dtype=jnp.int32)
    vals = jnp.asarray(vals)

    # Densify directly at the padded (Mp, Kp) shape, already in bf16: a single
    # scatter pass over A in HBM (no extra astype / pad passes).
    a = (jnp.zeros((Mp, Kp), jnp.bfloat16)
         .at[rows, cols].add(vals.astype(jnp.bfloat16)))

    xb = x.astype(jnp.bfloat16)
    if (Kp, Np) != (K, N):
        xb = jnp.pad(xb, ((0, Kp - K), (0, Np - N)))

    cost = pl.CostEstimate(
        flops=2 * Mp * Np * Kp,
        transcendentals=0,
        bytes_accessed=Mp * Kp * 2 + Kp * Np * 2 + Mp * Np * 4,
    )

    if Kb == 1:
        # ---- whole K in one tile: single MXU pass per output block ---------
        out = pl.pallas_call(
            _matmul_kernel_single_k,
            out_shape=jax.ShapeDtypeStruct((Mp, Np), jnp.float32),
            grid_spec=pltpu.PrefetchScalarGridSpec(
                num_scalar_prefetch=0,
                grid=(Mb, Nb),
                in_specs=[
                    pl.BlockSpec((tm, Kp), lambda i, j: (i, 0)),
                    pl.BlockSpec((Kp, tn), lambda i, j: (0, j)),
                ],
                out_specs=pl.BlockSpec((tm, tn), lambda i, j: (i, j)),
            ),
            compiler_params=pltpu.CompilerParams(
                dimension_semantics=("parallel", "parallel"),
                vmem_limit_bytes=_VMEM_LIMIT_BYTES,
            ),
            cost_estimate=cost,
        )(a, xb)
    else:
        # ---- K-loop with block-sparse DMA + MXU skip ------------------------
        # O(nnz) block occupancy from the COO indices (no dense reduction).
        ones = jnp.ones(rows.shape, dtype=jnp.int32)
        occ = jnp.zeros((Mb, Kb), jnp.int32).at[rows // tm, cols // tk].max(ones)
        cnt = jnp.sum(occ, axis=1, dtype=jnp.int32)                    # (Mb,)
        # Compacted nonzero k-block indices per row block (ascending k first),
        # past-count positions clamped to the last valid index so consecutive
        # grid steps map to the same block and Pallas elides the DMA.
        order = jnp.argsort(-occ, axis=1).astype(jnp.int32)            # (Mb, Kb)
        s = jnp.arange(Kb, dtype=jnp.int32)[None, :]
        last = jnp.maximum(cnt - 1, 0)[:, None]
        kidx = jnp.take_along_axis(order, jnp.minimum(s, last), axis=1)
        kidx_flat = kidx.reshape(-1)            # 1-D SMEM table (no 2-D pad)

        def a_map(i, j, k, kidx_ref, cnt_ref):
            return (i, kidx_ref[i * Kb + k])

        def x_map(i, j, k, kidx_ref, cnt_ref):
            return (kidx_ref[i * Kb + k], j)

        def o_map(i, j, k, kidx_ref, cnt_ref):
            return (i, j)

        out = pl.pallas_call(
            _matmul_kernel_kskip,
            out_shape=jax.ShapeDtypeStruct((Mp, Np), jnp.float32),
            grid_spec=pltpu.PrefetchScalarGridSpec(
                num_scalar_prefetch=2,
                grid=(Mb, Nb, Kb),
                in_specs=[
                    pl.BlockSpec((tm, tk), a_map),
                    pl.BlockSpec((tk, tn), x_map),
                ],
                out_specs=pl.BlockSpec((tm, tn), o_map),
            ),
            compiler_params=pltpu.CompilerParams(
                dimension_semantics=("parallel", "parallel", "arbitrary"),
                vmem_limit_bytes=_VMEM_LIMIT_BYTES,
            ),
            cost_estimate=cost,
        )(kidx_flat, cnt, a, xb)

    if (Mp, Np) != (M, N):
        out = out[:M, :N]
    return out


# ---------------------------------------------------------------------------
# Concrete SparseMatrix: COO storage, forward via the Pallas kernel.
# ---------------------------------------------------------------------------
class SparseMatrixPallas:
    """JAX/Pallas port of the (concrete) SparseMatrix forward pass."""

    def __init__(self, shape, rows, cols, vals):
        self.shape = tuple(shape)                       # (n_rows, n_cols)
        self.rows = jnp.asarray(rows, dtype=jnp.int32)  # (nnz,)
        self.cols = jnp.asarray(cols, dtype=jnp.int32)  # (nnz,)
        self.vals = jnp.asarray(vals)                   # (nnz,)

    def dense(self, dtype=jnp.float32):
        """Dense (n_rows, n_cols) version of the matrix (API parity only)."""
        n_rows, n_cols = self.shape
        d = jnp.zeros((n_rows, n_cols), dtype=jnp.float32)
        d = d.at[self.rows, self.cols].add(self.vals.astype(jnp.float32))
        return d.astype(dtype)

    def __matmul__(self, other):
        if other.shape[0] != self.shape[1]:
            raise ValueError(
                f"Shape mismatch: self.shape={self.shape}, "
                f"other.shape={other.shape}. "
                f"{self.shape[1]} != {other.shape[0]}."
            )
        return self._real_matmul(other)

    def _real_matmul(self, other):
        # Hot path: densifies straight into the padded bf16 layout the kernel
        # consumes (no unpadded f32 dense intermediate).
        return sparse_matmul_pallas(self.shape, self.rows, self.cols,
                                    self.vals, other)

    def t(self):
        return SparseMatrixPallas(
            (self.shape[1], self.shape[0]), self.cols, self.rows, self.vals
        )

    def detach(self):
        return SparseMatrixPallas(
            self.shape,
            jax.lax.stop_gradient(self.rows),
            jax.lax.stop_gradient(self.cols),
            jax.lax.stop_gradient(self.vals),
        )

    def forward(self, x):
        """Return self @ x."""
        return self @ x

    __call__ = forward


if __name__ == "__main__":
    key = jax.random.PRNGKey(0)
    keys = jax.random.split(key, 10)

    def ref_matmul(shape, rows, cols, vals, x):
        # Same bf16 densification as the kernel; f32 accumulation reference.
        a_bf = (jnp.zeros(shape, jnp.bfloat16)
                .at[rows, cols].add(vals.astype(jnp.bfloat16))
                .astype(jnp.float32))
        return a_bf @ x.astype(jnp.bfloat16).astype(jnp.float32)

    # ---- Test 1: small shape -> K collapses into a single MXU pass ---------
    n_rows, n_cols, d = 128, 256, 128
    nnz = 512
    rows = jax.random.randint(keys[0], (nnz,), 0, n_rows, dtype=jnp.int32)
    cols = jax.random.randint(keys[1], (nnz,), 0, n_cols, dtype=jnp.int32)
    vals = jax.random.normal(keys[2], (nnz,), dtype=jnp.float32)
    m = SparseMatrixPallas((n_rows, n_cols), rows, cols, vals)
    x = jax.random.normal(keys[3], (n_cols, d), dtype=jnp.float32)

    out = jax.block_until_ready(m(x))
    ref = ref_matmul((n_rows, n_cols), rows, cols, vals, x)
    assert out.shape == (n_rows, d)
    assert jnp.allclose(out, ref, atol=2e-2, rtol=2e-2)

    # ---- Test 2: larger K, auto tiles (collapsed) + forced K-loop with the
    # ---- compacted block-sparse DMA/MXU skip path ---------------------------
    n_rows2, n_cols2, d2 = 128, 2048, 256
    rows2 = jax.random.randint(keys[4], (300,), 0, n_rows2, dtype=jnp.int32)
    # Nonzeros confined to k-blocks 0 and 2 (of 4 when tk=512) so the
    # clamped/skip path is exercised for the empty blocks 1 and 3.
    cols_a = jax.random.randint(keys[5], (256,), 0, 512, dtype=jnp.int32)
    cols_b = jax.random.randint(keys[6], (44,), 1024, 1536, dtype=jnp.int32)
    cols2 = jnp.concatenate([cols_a, cols_b])
    vals2 = jax.random.normal(keys[7], (300,), dtype=jnp.float32)
    m2 = SparseMatrixPallas((n_rows2, n_cols2), rows2, cols2, vals2)
    x2 = jax.random.normal(keys[8], (n_cols2, d2), dtype=jnp.float32)
    ref2 = ref_matmul((n_rows2, n_cols2), rows2, cols2, vals2, x2)

    # Auto tiles (K=2048 collapses into one tile).
    out2a = jax.block_until_ready(m2(x2))
    assert out2a.shape == (n_rows2, d2)
    assert jnp.allclose(out2a, ref2, atol=2e-2, rtol=2e-2)

    # Forced small tk -> K-loop grid + block-sparse DMA/MXU skip.
    out2b = jax.block_until_ready(
        sparse_matmul_pallas(m2.shape, m2.rows, m2.cols, m2.vals, x2, tk=512)
    )
    assert out2b.shape == (n_rows2, d2)
    assert jnp.allclose(out2b, ref2, atol=2e-2, rtol=2e-2)

    print("KERNEL_OK")
</pallas_src>

<mosaic_0001>
module attributes {stable_mosaic.version = 11 : i64} {
  func.func @_matmul_kernel_single_k(%arg0: i32, %arg1: i32, %arg2: memref<64x256xbf16, #tpu.memory_space<vmem>>, %arg3: memref<256x128xbf16, #tpu.memory_space<vmem>>, %arg4: memref<64x128xf32, #tpu.memory_space<vmem>>) attributes {dimension_semantics = [#tpu.dimension_semantics<parallel>, #tpu.dimension_semantics<parallel>], iteration_bounds = array<i64: 2, 1>, scalar_prefetch = 0 : i64, scratch_operands = 0 : i64, tpu.core_type = #tpu.core_type<tc>, window_params = [{transform_indices = @transform_0, window_bounds = array<i64: 64, 256>}, {transform_indices = @transform_1, window_bounds = array<i64: 256, 128>}, {transform_indices = @transform_2, window_bounds = array<i64: 64, 128>}]} {
    %c0 = arith.constant 0 : index
    %c0_0 = arith.constant 0 : index
    %0 = vector.load %arg2[%c0, %c0_0] : memref<64x256xbf16, #tpu.memory_space<vmem>>, vector<64x256xbf16>
    %c0_1 = arith.constant 0 : index
    %c0_2 = arith.constant 0 : index
    %1 = vector.load %arg3[%c0_1, %c0_2] : memref<256x128xbf16, #tpu.memory_space<vmem>>, vector<256x128xbf16>
    %cst = arith.constant dense<0.000000e+00> : vector<64x128xf32>
    %2 = tpu.matmul %0, %1, %cst {dimension_numbers = #tpu.dot_dimension_numbers<[1], [0], [0], [1], [0, 0, 1, 1], [], []>} : vector<64x256xbf16>, vector<256x128xbf16>, vector<64x128xf32> -> vector<64x128xf32>
    %c0_3 = arith.constant 0 : index
    %c0_4 = arith.constant 0 : index
    %3 = vector.load %arg4[%c0_3, %c0_4] : memref<64x128xf32, #tpu.memory_space<vmem>>, vector<64x128xf32>
    tpu.vector_store %arg4[%c0_3, %c0_4], %2 {strides = array<i32>} : memref<64x128xf32, #tpu.memory_space<vmem>>, vector<64x128xf32>,
    return
  }
  func.func @transform_0(%arg0: i32, %arg1: i32) -> (i32, i32) {
    %c0_i32 = arith.constant 0 : i32
    %c0_i32_0 = arith.constant 0 : i32
    return %arg0, %c0_i32 : i32, i32
  }
  func.func @transform_1(%arg0: i32, %arg1: i32) -> (i32, i32) {
    %c0_i32 = arith.constant 0 : i32
    %c0_i32_0 = arith.constant 0 : i32
    return %c0_i32, %arg1 : i32, i32
  }
  func.func @transform_2(%arg0: i32, %arg1: i32) -> (i32, i32) {
    %c0_i32 = arith.constant 0 : i32
    return %arg0, %arg1 : i32, i32
  }
}

</mosaic_0001>

<bundles_post_ra>
// kernel: tpu_custom_call.1
= control target key start
LH: loop header
LB: loop body
LE: loop exit
PB: predicated region body
PF: predicated region fallthrough
CT: control target
= control target key end

     0   :  { %7 = vsyncpa [#allocation3], 0  ;;  %s1172_s0 = inlined_call_operand.hbm [shape: bf16[128,256], index: 0, kind: input, shape index: {}]   ;;  %s1173_s1 = inlined_call_operand.hbm [shape: bf16[256,128], index: 1, kind: input, shape index: {}]   ;;  %s1174_s2 = inlined_call_operand.hbm [shape: f32[128,128], index: 2, kind: output, shape index: {}]  }
   0x1   :  { %9 = vsyncpa [#allocation3 + $0x1], 0 }
   0x2   :  { %10 = vsyncpa [#allocation6], 0 }
   0x3   :  { %11 = vsyncpa [#allocation4], 0 }
   0x4   :  { %13 = vsyncpa [#allocation4 + $0x1], 0  ;;  %s939_s9 = smov 0   ;;  %s941_s10 = smov 0  }
   0x5   :  { %s943_s11 = smov 0   ;;  %s945_s12 = smov 0  }
   0x6   :  { %s947_s13 = smov 0   ;;  %s949_s14 = smov 0  }
   0x7 LB: > { %s561_s15 = sadd.s32 4294967295, %s913_s14   ;;  %s562_s16 = sadd.s32 4294967294, %s913_s14   ;;  %s913_s14 = sphi %s949_s14, %s19_s14   ;;  %s909_s13 = sphi %s947_s13, %s1198_s13   ;;  %s905_s12 = sphi %s945_s12, %s1197_s12   ;;  %s901_s11 = sphi %s943_s11, %s1196_s11   ;;  %s897_s10 = sphi %s941_s10, %s1195_s10   ;;  %s893_s9 = sphi %s939_s9, %s1194_s9  }
   0x8   : > { %p51_p0 = scmp.ne.s32.totalorder %s897_s10, %s893_s9  ;;  %p973_p1 = scmp.eq.s32.totalorder %s561_s15, 0 }
   0x9   : > { %p977_p2 = scmp.eq.s32.totalorder %s561_s15, 1  ;;  %p109_p3 = scmp.eq.s32.totalorder %s562_s16, 1 }
   0xa   : > { %s1179_s17 = scalar_select %p973_p1, 1, 0 }
   0xb   : > { %s1180_s18 = scalar_select %p977_p2, 1, 0 }
   0xc   : > { %p983_p4 = por %p973_p1, %p51_p0  ;;  %p563_p5 = scmp.ge.s32.totalorder %s913_s14, 1 }
   0xd   : > { %p988_p6 = por %p109_p3, %p51_p0  ;;  %p116_p7 = scmp.lt.s32.totalorder %s913_s14, 3 }
   0xe   : > { %s1181_s19 = scalar_select %p983_p4, 1, 0 }
   0xf   : > { %s1182_s20 = scalar_select %p988_p6, 1, 0 }
  0x10   : > { %p993_p8 = pnand %p563_p5, %p116_p7  ;;  %s915_s22 = smov [#allocation5]  }
  0x11   : > { %s130_s23 = sshll.u32 %s915_s22, 4  ;;  %s31_s25 = sadd.s32 1, %s909_s13  ;;  %s131_s23 = int_to_ptr.vmem [resolvable:$true] %s130_s23 }
  0x12   : > { %s1183_s21 = scalar_select %p993_p8, 1, 0 }
  0x13   : > { %p670_p9 = pneg %p993_p8  ;;  %s769_s28 = scalar_lea.hbm %s1173_s1, 2048 }
  0x14   : > { %p770_p12 = scmp.ne.s32.totalorder %s1173_s1, %s769_s28  ;;  %p776_p5 = scmp.lt.u32.totalorder %s769_s28, %s1173_s1 }
  0x15   : > { %p1002_p11 = pnand %p670_p9, %p973_p1 }
  0x17   : > { %p771_p13 = pneg %p1002_p11 }
  0x19   : > { %p772_p0 = pnand %p771_p13, %p770_p12 }
  0x1b   : > { %p773_p3 = pneg %p772_p0 }
  0x1d   : > { %p778_p7 = pnand %p776_p5, %p773_p3 }
  0x1f   : > { %781 = shalt.err (!%p778_p7)
}
  0x20   : > { %s782_s5 = scalar_lea.vmem %s131_s23, 2048  ;;  %p790_p1 = scmp.lt.s32.totalorder %s131_s23, %s131_s23 }
  0x21   : > { %p783_p9 = scmp.ne.s32.totalorder %s131_s23, %s782_s5  ;;  %p791_p4 = scmp.lt.s32.totalorder %s782_s5, %s782_s5 }
  0x23   : > { %p785_p10 = pnand %p783_p9, %p771_p13  ;;  %p792_p8 = por %p791_p4, %p790_p1 }
  0x25   : > { %p786_p6 = pneg %p785_p10 }
  0x27   : > { %p793_p2 = pnand %p792_p8, %p786_p6 }
  0x29   : > { %796 = shalt.err (!%p793_p2)
}
  0x2a   : > { %s916_s6 = smov 64   ;;  %s917_s7 = smov 4  }
  0x2b   : > { %673 = dma.hbm_to_vmem [thread:$0]  (!%p1002_p11), %s1173_s1, 2048, %s131_s23, [#allocation6], %s916_s6, %s916_s6, %s917_s7  }
  0x2c   : > { %p33_p1 = scmp.ge.s32.totalorder %s31_s25, 2  ;;  %s38_s16 = sadd.s32 1, %s901_s11 }
  0x2d   : > { %p45_p2 = scmp.ne.s32.totalorder %s901_s11, %s897_s10  ;;  %p46_p4 = scmp.eq.s32.totalorder %s913_s14, 0 }
  0x2e   : > { %s1200_s25 = smov (%p33_p1, %s31_s25), 0  ;;  %p1186_p8 = scmp.ne.s32.totalorder %s1180_s18, 0 }
  0x2f   : > { %p1029_p6 = por %p46_p4, %p45_p2  ;;  %s35_s24 = ssub.s32 %s909_s13, %s1200_s25 }
  0x30   : > { %p1035_p10 = por %p1186_p8, %p45_p2  ;;  %p683_p12 = scmp.lt.s32.totalorder %s913_s14, 2 }
  0x31   : > { %p36_p11 = scmp.eq.s32.totalorder %s35_s24, 0  ;;  %s144_s23 = sand.u32 1, %s901_s11  }
  0x32   : > { %s566_s27 = sshll.u32 %s144_s23, 6  ;;  %s604_s29 = sshll.u32 %s909_s13, 10 }
  0x33   : > { %s1044_s28 = scalar_select %p36_p11, %s901_s11, %s38_s16  }
  0x34   : > { %s1050_s4 = scalar_lea.hbm %s1172_s0, %s604_s29  ;;  %s148_s18 = scalar_lea.vmem [#allocation2], %s566_s27 }
  0x35   : > { %s156_s5 = sshll.u32 %s148_s18, 4  ;;  %p1056_p13 = pnand %p683_p12, %p1029_p6  ;;  %s1052_s5 = int_to_ptr.vmem [resolvable:$true] %s156_s5 }
  0x36   : > { %s1060_s7 = scalar_lea.sflag [#allocation3], %s144_s23  ;;  %s797_s8 = scalar_lea.hbm %s1050_s4, 1024 }
  0x37   : > { %p798_p0 = scmp.ne.s32.totalorder %s1050_s4, %s797_s8  ;;  %p799_p3 = pneg %p1056_p13 }
  0x38   : > { %s802_s22 = scalar_lea.hbm %s1172_s0, 2048  ;;  %p803_p9 = scmp.lt.u32.totalorder %s1050_s4, %s1172_s0 }
  0x39   : > { %p800_p5 = pnand %p799_p3, %p798_p0  ;;  %p804_p1 = scmp.lt.u32.totalorder %s802_s22, %s797_s8 }
  0x3a   : > { %p806_p4 = scmp.lt.u32.totalorder %s797_s8, %s1050_s4 }
  0x3b   : > { %p801_p7 = pneg %p800_p5  ;;  %p805_p2 = por %p804_p1, %p803_p9 }
  0x3d   : > { %p807_p6 = por %p806_p4, %p805_p2 }
  0x3f   : > { %p808_p8 = pnand %p807_p6, %p801_p7 }
  0x41   : > { %811 = shalt.err (!%p808_p8)
}
  0x42   : > { %s812_s23 = scalar_lea.vmem %s1052_s5, 1024  ;;  %s918_s29 = smov [#allocation2]  }
  0x43   : > { %p813_p12 = scmp.ne.s32.totalorder %s1052_s5, %s812_s23  ;;  %s817_s30 = sshll.u32 %s918_s29, 4  ;;  %s818_s30 = int_to_ptr.vmem [resolvable:$false] %s817_s30 }
  0x44   : > { %s819_s3 = scalar_lea.vmem %s818_s30, 2048  ;;  %p820_p5 = scmp.lt.s32.totalorder %s1052_s5, %s818_s30 }
  0x45   : > { %p815_p11 = pnand %p813_p12, %p799_p3  ;;  %p821_p9 = scmp.lt.s32.totalorder %s819_s3, %s812_s23 }
  0x47   : > { %p816_p0 = pneg %p815_p11  ;;  %p822_p1 = por %p821_p9, %p820_p5 }
  0x49   : > { %p823_p2 = pnand %p822_p1, %p816_p0 }
  0x4b   : > { %826 = shalt.err (!%p823_p2)
}
  0x4c   : > { %s919_s18 = smov 128   ;;  %s920_s8 = smov 8  }
  0x4d   : > { %677 = dma.hbm_to_vmem [thread:$0]  (!%p1056_p13), %s1050_s4, 1024, %s1052_s5, %s1060_s7, %s919_s18, %s919_s18, %s920_s8  }
  0x4e   : > { %p1189_p3 = scmp.ne.s32.totalorder %s1183_s21, 0 }
  0x4f   : > { %s1091_s15 = sand.u32 (!%p1189_p3), 1, %s897_s10   ;;  %p1190_p7 = scmp.ne.s32.totalorder (!%p1189_p3), %s1181_s19, 0 }
  0x50   : > { %168 = sbr.rel (%p1189_p3) target bundleno = 364 (0x16c), region = 28  ;;  %s571_s16 = sshll.u32 (!%p1189_p3), %s1091_s15, 6 }
  0x51   : > { %s171_s22 = scalar_lea.sflag (!%p1189_p3), [#allocation3], %s1091_s15  ;;  %s1097_s24 = scalar_lea.vmem (!%p1189_p3), [#allocation2], %s571_s16 }
  0x57   : > { %880 = dma.done.wait (%p1190_p7), %s171_s22, 1024  }
  0x58   : > { %882 = vsyncadd (%p1190_p7), %s171_s22, 4294966272  ;;  %p1191_p13 = scmp.ne.s32.totalorder %s1179_s17, 0 }
  0x5a   : > { %884 = dma.done.wait (%p1191_p13), [#allocation6], 2048  }
  0x5b   : > { %886 = vsyncadd (%p1191_p13), [#allocation6], 4294965248  ;;  %v741_v0 = vld [vmem:[#allocation5 + $0x40] sm:$0xff]   ;;  %v743_v2 = vld [vmem:[#allocation5 + $0x48] sm:$0xff]   ;;  %s198_s17 = scalar_lea.vmem [#allocation7], %s571_s16  ;;  %s605_s21 = sshll.u32 %s905_s12, 10 }
  0x5c   : > { %v742_v1 = vld [vmem:[#allocation5] sm:$0xff]   ;;  %606 = vmatprep.subr.bf16.mxu0 %v741_v0  ;;  %646 = vmatprep.subr.bf16.mxu1 %v741_v0  ;;  %v744_v3 = vld [vmem:[#allocation5 + $0x8] sm:$0xff]   ;;  %v745_v4 = vld [vmem:[#allocation5 + $0x50] sm:$0xff]   ;;  %s466_s19 = sshll.u32 %s198_s17, 4  ;;  %s1123_s6 = scalar_lea.hbm %s1174_s2, %s605_s21  ;;  %s1118_s19 = int_to_ptr.vmem [resolvable:$true] %s466_s19 }
  0x5d   : > { %607 = vmatpush3.bf16.msra.mxu0 %v742_v1  ;;  %654 = vmatpush3.bf16.msra.mxu1 %v742_v1  ;;  %v746_v5 = vld [vmem:[#allocation5 + $0x10] sm:$0xff]   ;;  %v747_v6 = vld [vmem:[#allocation5 + $0x58] sm:$0xff]   ;;  %v749_v8 = vld [vmem:[#allocation5 + $0x60] sm:$0xff]   ;;  %s452_s12 = scalar_lea.sflag [#allocation4], %s1091_s15  ;;  %s827_s7 = scalar_lea.vmem %s1118_s19, 1024 }
  0x5e   : > { %608 = vmatprep.subr.bf16.mxu0 %v743_v2  ;;  %647 = vmatprep.subr.bf16.mxu1 %v743_v2  ;;  %v748_v7 = vld [vmem:[#allocation5 + $0x18] sm:$0xff]   ;;  %v750_v9 = vld [vmem:[#allocation5 + $0x20] sm:$0xff]   ;;  %v751_v10 = vld [vmem:[#allocation5 + $0x68] sm:$0xff]   ;;  %p828_p4 = scmp.ne.s32.totalorder %s1118_s19, %s827_s7  ;;  %s921_s27 = smov [#allocation7]  }
  0x5f   : > { %v759_v11 = vld [vmem:[%s1097_s24 + $0x4] ss:$8 sps:$4 sm:$0xff]   ;;  %v753_v14 = vld [vmem:[#allocation5 + $0x70] sm:$0xff]   ;;  %v755_v16 = vld [vmem:[#allocation5 + $0x78] sm:$0xff]   ;;  %s831_s23 = sshll.u32 %s921_s27, 4  ;;  %s832_s23 = int_to_ptr.vmem [resolvable:$false] %s831_s23 }
  0x60   : > { %v762_v12 = vld [vmem:[%s1097_s24 + $0x24] ss:$8 sps:$4 sm:$0xff]   ;;  %410 = vmatprep.mubr.bf16.mxu0 %v759_v11  ;;  %v754_v15 = vld [vmem:[#allocation5 + $0x30] sm:$0xff]   ;;  %v756_v17 = vld [vmem:[#allocation5 + $0x38] sm:$0xff]   ;;  %p829_p6 = pnand %p828_p4, %p1035_p10  ;;  %s833_s29 = scalar_lea.vmem %s832_s23, 2048 }
  0x61   : > { %609 = vmatpush3.bf16.msra.mxu0 %v744_v3  ;;  %655 = vmatpush3.bf16.msra.mxu1 %v744_v3  ;;  %v752_v13 = vld [vmem:[#allocation5 + $0x28] sm:$0xff]   ;;  %v763_v20 = vld [vmem:[%s1097_s24 + $0x14] ss:$8 sps:$4 sm:$0xff]   ;;  %v767_v22 = vld [vmem:[%s1097_s24 + $0x10] ss:$8 sps:$4 sm:$0xff]   ;;  %p834_p12 = scmp.lt.s32.totalorder %s1118_s19, %s832_s23  ;;  %p835_p11 = scmp.lt.s32.totalorder %s833_s29, %s827_s7 }
  0x62   : > { %610 = vmatprep.subr.bf16.mxu0 %v745_v4  ;;  %648 = vmatprep.subr.bf16.mxu1 %v745_v4  ;;  %v757_v18 = vld [vmem:[%s1097_s24] ss:$8 sps:$4 sm:$0xff]   ;;  %v765_v21 = vld [vmem:[%s1097_s24 + $0x34] ss:$8 sps:$4 sm:$0xff]   ;;  %v768_v23 = vld [vmem:[%s1097_s24 + $0x30] ss:$8 sps:$4 sm:$0xff]   ;;  %p830_p8 = pneg %p829_p6 }
  0x63   : > { %426 = vmatprep.mubr.bf16.mxu1 %v762_v12  ;;  %v760_v19 = vld [vmem:[%s1097_s24 + $0x20] ss:$8 sps:$4 sm:$0xff]   ;;  %p836_p0 = por %p835_p11, %p834_p12 }
  0x65   : > { %611 = vmatpush3.bf16.msra.mxu0 %v746_v5  ;;  %656 = vmatpush3.bf16.msra.mxu1 %v746_v5  ;;  %p837_p5 = pnand %p836_p0, %p830_p8 }
  0x66   : > { %612 = vmatprep.subr.bf16.mxu0 %v747_v6  ;;  %649 = vmatprep.subr.bf16.mxu1 %v747_v6 }
  0x69   : > { %613 = vmatpush3.bf16.msra.mxu0 %v748_v7  ;;  %657 = vmatpush3.bf16.msra.mxu1 %v748_v7 }
  0x6a   : > { %614 = vmatprep.subr.bf16.mxu0 %v749_v8  ;;  %650 = vmatprep.subr.bf16.mxu1 %v749_v8 }
  0x6d   : > { %615 = vmatpush3.bf16.msra.mxu0 %v750_v9  ;;  %658 = vmatpush3.bf16.msra.mxu1 %v750_v9 }
  0x6e   : > { %616 = vmatprep.subr.bf16.mxu0 %v751_v10  ;;  %651 = vmatprep.subr.bf16.mxu1 %v751_v10 }
  0x71   : > { %617 = vmatpush3.bf16.msra.mxu0 %v752_v13  ;;  %659 = vmatpush3.bf16.msra.mxu1 %v752_v13 }
  0x72   : > { %618 = vmatprep.subr.bf16.mxu0 %v753_v14  ;;  %652 = vmatprep.subr.bf16.mxu1 %v753_v14 }
  0x75   : > { %619 = vmatpush3.bf16.msra.mxu0 %v754_v15  ;;  %660 = vmatpush3.bf16.msra.mxu1 %v754_v15 }
  0x76   : > { %620 = vmatprep.subr.bf16.mxu0 %v755_v16  ;;  %653 = vmatprep.subr.bf16.mxu1 %v755_v16 }
  0x79   : > { %621 = vmatpush3.bf16.msra.mxu0 %v756_v17  ;;  %661 = vmatpush3.bf16.msra.mxu1 %v756_v17 }
  0x7c   : > { %411 = vmatmul.mubr.bf16.vlgmr.msra.gmra.mrb[0].mxu0 %v757_v18  ;;  %427 = vmatmul.mubr.bf16.vlgmr.msra.gmra.mrb[0].mxu1 %v760_v19 }
  0x7d   : > { %418 = vmatprep.mubr.bf16.mxu0 %v763_v20  ;;  %434 = vmatprep.mubr.bf16.mxu1 %v765_v21 }
  0x84   : > { %419 = vmatmul.mubr.bf16.gmra.mrb[4].mxu0 %v767_v22  ;;  %435 = vmatmul.mubr.bf16.gmra.mrb[4].mxu1 %v768_v23 }
 0x14f   : > { %v622_v24 = vpop.f32.mrb[0].mxu0  ;;  %v634_v25 = vpop.f32.mrb[0].mxu1 }
 0x150   : > { %v623_v26 = vpop.f32.mrb[1].mxu0  ;;  %v635_v27 = vpop.f32.mrb[1].mxu1 }
 0x151   : > { %v624_v28 = vadd.f32 %v623_v26, %v622_v24  ;;  %v636_v29 = vadd.f32 %v635_v27, %v634_v25  ;;  %v625_v30 = vpop.f32.mrb[2].mxu0  ;;  %v637_v31 = vpop.f32.mrb[2].mxu1 }
 0x152   : > { %v626_v32 = vpop.f32.mrb[3].mxu0  ;;  %v638_v33 = vpop.f32.mrb[3].mxu1 }
 0x153   : > { %443 = vst [vmem:[%s198_s17] sm:$0xff] %v624_v28  ;;  %447 = vst [vmem:[%s198_s17 + $0x20] sm:$0xff] %v636_v29  ;;  %v627_v34 = vadd.f32 %v626_v32, %v625_v30  ;;  %v639_v35 = vadd.f32 %v638_v33, %v637_v31 }
 0x155   : > { %444 = vst [vmem:[%s198_s17 + $0x8] sm:$0xff] %v627_v34  ;;  %448 = vst [vmem:[%s198_s17 + $0x28] sm:$0xff] %v639_v35 }
 0x157   : > { %v628_v36 = vpop.f32.mrb[4].mxu0  ;;  %v640_v37 = vpop.f32.mrb[4].mxu1 }
 0x158   : > { %v629_v38 = vpop.f32.mrb[5].mxu0  ;;  %v641_v39 = vpop.f32.mrb[5].mxu1 }
 0x159   : > { %v630_v40 = vadd.f32 %v629_v38, %v628_v36  ;;  %v642_v41 = vadd.f32 %v641_v39, %v640_v37  ;;  %v631_v42 = vpop.f32.mrb[6].mxu0  ;;  %v643_v43 = vpop.f32.mrb[6].mxu1 }
 0x15a   : > { %v632_v44 = vpop.f32.mrb[7].mxu0  ;;  %v644_v45 = vpop.f32.mrb[7].mxu1 }
 0x15b   : > { %445 = vst [vmem:[%s198_s17 + $0x10] sm:$0xff] %v630_v40  ;;  %449 = vst [vmem:[%s198_s17 + $0x30] sm:$0xff] %v642_v41  ;;  %v633_v46 = vadd.f32 %v632_v44, %v631_v42  ;;  %v645_v47 = vadd.f32 %v644_v45, %v643_v43 }
 0x15d   : > { %446 = vst [vmem:[%s198_s17 + $0x18] sm:$0xff] %v633_v46  ;;  %450 = vst [vmem:[%s198_s17 + $0x38] sm:$0xff] %v645_v47 }
 0x15e   : > { %840 = shalt.err (!%p837_p5)
}
 0x15f   : > { %s841_s30 = scalar_lea.hbm %s1123_s6, 1024  ;;  %s845_s8 = scalar_lea.hbm %s1174_s2, 2048 }
 0x160   : > { %p842_p9 = scmp.ne.s32.totalorder %s1123_s6, %s841_s30  ;;  %p846_p3 = scmp.lt.u32.totalorder %s1123_s6, %s1174_s2 }
 0x161   : > { %p847_p7 = scmp.lt.u32.totalorder %s845_s8, %s841_s30  ;;  %p849_p4 = scmp.lt.u32.totalorder %s841_s30, %s1123_s6 }
 0x162   : > { %p843_p1 = pnand %p842_p9, %p1035_p10 }
 0x163   : > { %p848_p13 = por %p847_p7, %p846_p3 }
 0x164   : > { %p844_p2 = pneg %p843_p1 }
 0x165   : > { %p850_p6 = por %p849_p4, %p848_p13 }
 0x167   : > { %p851_p8 = pnand %p850_p6, %p844_p2 }
 0x169   : > { %854 = shalt.err (!%p851_p8)
}
 0x16a   : > { %s922_s24 = smov 128   ;;  %s923_s17 = smov 8  }
 0x16b   : > { %668 = dma.vmem_to_hbm [thread:$0]  (%p1035_p10), %s1118_s19, 1024, %s1123_s6, %s452_s12, %s922_s24, %s922_s24, %s923_s17  }
 0x16c PF: > { %s481_s21 = sand.u32 1, %s893_s9   ;;  %p1192_p12 = scmp.ne.s32.totalorder %s1182_s20, 0 }
 0x16d   : > { %p1193_p11 = scmp.ge.s32.totalorder %s913_s14, 2  ;;  %s482_s4 = scalar_lea.sflag [#allocation4], %s481_s21 }
 0x16f   : > { %p679_p0 = pnand %p1193_p11, %p1192_p12 }
 0x171   : > { %888 = dma.done.wait (!%p679_p0), %s482_s4, 1024  }
 0x172   : > { %890 = vsyncadd (!%p679_p0), %s482_s4, 4294966272  ;;  %s19_s14 = sadd.s32 1, %s913_s14   ;;  %s1194_s9 = smov %s897_s10 }
 0x173   : > { %p16_p5 = scmp.ge.s32.totalorder %s19_s14, 4   ;;  %s1195_s10 = smov %s901_s11 }
 0x174   : > { %s1196_s11 = smov %s1044_s28  ;;  %s1197_s12 = smov %s909_s13 }
 0x175   : > { %s1198_s13 = smov %s1200_s25  ;;  %18 = sbr.rel (!%p16_p5) target bundleno = 7 (0x7), region = 78 }
 0x17c   :  { %487 = vsyncpa [#allocation3], 1 }
 0x17d   :  { %489 = vsyncpa [#allocation3 + $0x1], 1 }
 0x17e   :  { %490 = vsyncpa [#allocation6], 1 }
 0x17f   :  { %491 = vsyncpa [#allocation4], 1 }
 0x180   :  { %493 = vsyncpa [#allocation4 + $0x1], 1 }

</bundles_post_ra>
